<compile_context>
chip_gen: v7x
topology: tpu7x:2x2x1
jax: 0.10.0
libtpu: 0.0.40
codegen_flags: <defaults>
</compile_context>

<pallas_src>
import jax
import jax.numpy as jnp
import numpy as np
from jax.experimental import pallas as pl
from jax.experimental.pallas import tpu as pltpu

BATCH = 2
C_IN = 3
SPATIAL = 22


# ----------------------------------------------------------------------------
# Single fused kernel: conv stages + MLP head + softmax, all VMEM resident.
# ----------------------------------------------------------------------------
def fused_convnet_kernel(x_ref,
                         a1_ref, b1_ref, s1_ref,
                         a2_ref, b2_ref, s2_ref,
                         a3_ref, b3_ref, s3_ref,
                         w1_ref, c1_ref, w2_ref, c2_ref, w3_ref, c3_ref,
                         o_ref):

    def conv_relu_pool(x, a_ref_, brow_ref_, s_ref_, cout):
        # x    : (B*H, L_in)   activations, lane index = w*stride + c
        # a    : (3, L_in, Wc*cout) banded weights (dx taps + Cin folded in)
        # brow : (1, Wc*cout)  bias tiled over w
        # s    : (B*Ho, B*H-3) 0/1 row-compaction matrix (picks rows b*H + 2i)
        a = a_ref_[...]                 # load weights once, slice in registers
        brow = brow_ref_[...]
        s = s_ref_[...]
        n = x.shape[0] - 2              # rows of the conv accumulator
        # 3x3 conv as 3 banded MXU matmuls (dy = row shift of the slab).
        acc = jnp.dot(x[0:n, :], a[0], preferred_element_type=jnp.float32)
        acc = acc + jnp.dot(x[1:n + 1, :], a[1], preferred_element_type=jnp.float32)
        acc = acc + jnp.dot(x[2:n + 2, :], a[2], preferred_element_type=jnp.float32)
        y = jnp.maximum(acc + brow, 0.0)                      # bias + ReLU
        # 2x2 / stride-2 max pool, vectorized:
        #   lanes: pair adjacent w-groups (offset = cout lanes); even groups valid
        m = jnp.maximum(y[:, :-cout], y[:, cout:])
        #   rows : pair adjacent rows; rows b*H + 2i valid
        m = jnp.maximum(m[:-1, :], m[1:, :])
        #   compact valid rows (and drop cross-batch garbage) with one matmul
        return jnp.dot(s, m, preferred_element_type=jnp.float32)

    x = conv_relu_pool(x_ref[...], a1_ref, b1_ref, s1_ref, 4)   # (B*10, 76)
    x = conv_relu_pool(x,          a2_ref, b2_ref, s2_ref, 6)   # (B*4,  42)
    x = conv_relu_pool(x,          a3_ref, b3_ref, s3_ref, 8)   # (B,     8)
    # x == flattened features (spatial is 1x1, so order == torch .view(B, -1)).

    h = jnp.maximum(jnp.dot(x, w1_ref[...], preferred_element_type=jnp.float32)
                    + c1_ref[...], 0.0)
    h = jnp.maximum(jnp.dot(h, w2_ref[...], preferred_element_type=jnp.float32)
                    + c2_ref[...], 0.0)
    logits = (jnp.dot(h, w3_ref[...], preferred_element_type=jnp.float32)
              + c3_ref[...])

    mx = jnp.max(logits, axis=-1, keepdims=True)
    e = jnp.exp(logits - mx)
    ssum = jnp.sum(e, axis=-1, keepdims=True)
    r = pl.reciprocal(ssum, approx=True)       # EUP slot (otherwise idle)
    r = r * (2.0 - ssum * r)                   # one Newton step -> ~f32 accuracy
    o_ref[...] = e * r                         # single dense (B,10) store


# ----------------------------------------------------------------------------
# One-time weight repacking (off the hot path)
# ----------------------------------------------------------------------------
def _band_matrices(w_hwio, n_w_in, in_stride, in_width):
    """A[dy, (w+dx)*in_stride + ci, w*Cout + co] = w[dy, dx, ci, co]."""
    KH, KW, Cin, Cout = w_hwio.shape
    n_w_out = n_w_in - KW + 1
    dy, dx, ci, co, w = np.meshgrid(np.arange(KH), np.arange(KW), np.arange(Cin),
                                    np.arange(Cout), np.arange(n_w_out),
                                    indexing='ij')
    rows = (w + dx) * in_stride + ci
    cols = w * Cout + co
    A = jnp.zeros((KH, in_width, n_w_out * Cout), jnp.float32)
    return A.at[dy, rows, cols].set(w_hwio[dy, dx, ci, co])


def _row_select(batch, h_in, h_out):
    """S[b*h_out + i, b*h_in + 2*i] = 1 over (batch*h_out, batch*h_in - 3)."""
    S = np.zeros((batch * h_out, batch * h_in - 3), np.float32)
    for b in range(batch):
        for i in range(h_out):
            S[b * h_out + i, b * h_in + 2 * i] = 1.0
    return jnp.asarray(S)


def pack_params(p):
    return {
        'a1': _band_matrices(p['wc1'], 22, 3, 66),
        'b1': jnp.tile(p['bc1'], 20).reshape(1, 80),
        's1': _row_select(BATCH, 22, 10),
        'a2': _band_matrices(p['wc2'], 10, 8, 76),
        'b2': jnp.tile(p['bc2'], 8).reshape(1, 48),
        's2': _row_select(BATCH, 10, 4),
        'a3': _band_matrices(p['wc3'], 4, 12, 42),
        'b3': jnp.tile(p['bc3'], 2).reshape(1, 16),
        's3': _row_select(BATCH, 4, 1),
        'w1': p['wl1'], 'c1': p['bl1'].reshape(1, -1),
        'w2': p['wl2'], 'c2': p['bl2'].reshape(1, -1),
        'w3': p['wl3'], 'c3': p['bl3'].reshape(1, -1),
    }


# ----------------------------------------------------------------------------
# Forward wrapper: one tiny input repack + ONE pallas_call
# ----------------------------------------------------------------------------
@jax.jit
def conv_model_forward(x_nchw, packed):
    B, C, H, W = x_nchw.shape
    # NCHW -> (B*H, W*C) lane-dense slab; the only non-kernel data-movement op.
    x2d = jnp.transpose(x_nchw, (0, 2, 3, 1)).reshape(B * H, W * C)
    args = (x2d,
            packed['a1'], packed['b1'], packed['s1'],
            packed['a2'], packed['b2'], packed['s2'],
            packed['a3'], packed['b3'], packed['s3'],
            packed['w1'], packed['c1'], packed['w2'], packed['c2'],
            packed['w3'], packed['c3'])
    return pl.pallas_call(
        fused_convnet_kernel,
        out_shape=jax.ShapeDtypeStruct((B, 10), jnp.float32),
        in_specs=[pl.BlockSpec(memory_space=pltpu.MemorySpace.VMEM)
                  for _ in args],
        out_specs=pl.BlockSpec(memory_space=pltpu.MemorySpace.VMEM),
    )(*args)


# ----------------------------------------------------------------------------
# Deterministic parameter init (PyTorch-style uniform(-1/sqrt(fan_in), ...))
# ----------------------------------------------------------------------------
def init_params(key):
    def u(k, shape, fan_in):
        bound = 1.0 / np.sqrt(fan_in)
        return jax.random.uniform(k, shape, jnp.float32, -bound, bound)

    ks = jax.random.split(key, 12)
    return {
        'wc1': u(ks[0], (3, 3, C_IN, 4), 9 * C_IN), 'bc1': u(ks[1], (4,), 9 * C_IN),
        'wc2': u(ks[2], (3, 3, 4, 6), 9 * 4),       'bc2': u(ks[3], (6,), 9 * 4),
        'wc3': u(ks[4], (3, 3, 6, 8), 9 * 6),       'bc3': u(ks[5], (8,), 9 * 6),
        'wl1': u(ks[6], (8, 128), 8),               'bl1': u(ks[7], (128,), 8),
        'wl2': u(ks[8], (128, 64), 128),            'bl2': u(ks[9], (64,), 128),
        'wl3': u(ks[10], (64, 10), 64),             'bl3': u(ks[11], (10,), 64),
    }


# ----------------------------------------------------------------------------
# Pure-JAX reference (correctness check)
# ----------------------------------------------------------------------------
def reference_forward(x_nchw, p):
    x = jnp.transpose(x_nchw, (0, 2, 3, 1))
    for w, b in [(p['wc1'], p['bc1']), (p['wc2'], p['bc2']), (p['wc3'], p['bc3'])]:
        x = jax.lax.conv_general_dilated(
            x, w, window_strides=(1, 1), padding='VALID',
            dimension_numbers=('NHWC', 'HWIO', 'NHWC')) + b
        x = jnp.maximum(x, 0.0)
        B, H, W, C = x.shape
        x = x.reshape(B, H // 2, 2, W // 2, 2, C).max(axis=(2, 4))
    x = jnp.transpose(x, (0, 3, 1, 2)).reshape(x.shape[0], -1)
    h = jnp.maximum(x @ p['wl1'] + p['bl1'], 0.0)
    h = jnp.maximum(h @ p['wl2'] + p['bl2'], 0.0)
    return jax.nn.softmax(h @ p['wl3'] + p['bl3'], axis=-1)


if __name__ == "__main__":
    key = jax.random.PRNGKey(0)
    kx, kp = jax.random.split(key)
    x = jax.random.normal(kx, (BATCH, C_IN, SPATIAL, SPATIAL), jnp.float32)  # NCHW
    params = init_params(kp)
    packed = pack_params(params)            # one-time weight repack

    out = conv_model_forward(x, packed)
    out = jax.block_until_ready(out)

    ref = reference_forward(x, params)
    assert out.shape == (BATCH, 10)
    np.testing.assert_allclose(np.asarray(out), np.asarray(ref), rtol=1e-3, atol=1e-3)
    assert np.allclose(np.asarray(out).sum(axis=-1), 1.0, atol=1e-4)
    print("KERNEL_OK")
</pallas_src>

<mosaic_0001>
module attributes {stable_mosaic.version = 11 : i64} {
  func.func @fused_convnet_kernel(%arg0: memref<44x66xf32, #tpu.memory_space<vmem>>, %arg1: memref<3x66x80xf32, #tpu.memory_space<vmem>>, %arg2: memref<1x80xf32, #tpu.memory_space<vmem>>, %arg3: memref<20x41xf32, #tpu.memory_space<vmem>>, %arg4: memref<3x76x48xf32, #tpu.memory_space<vmem>>, %arg5: memref<1x48xf32, #tpu.memory_space<vmem>>, %arg6: memref<8x17xf32, #tpu.memory_space<vmem>>, %arg7: memref<3x42x16xf32, #tpu.memory_space<vmem>>, %arg8: memref<1x16xf32, #tpu.memory_space<vmem>>, %arg9: memref<2x5xf32, #tpu.memory_space<vmem>>, %arg10: memref<8x128xf32, #tpu.memory_space<vmem>>, %arg11: memref<1x128xf32, #tpu.memory_space<vmem>>, %arg12: memref<128x64xf32, #tpu.memory_space<vmem>>, %arg13: memref<1x64xf32, #tpu.memory_space<vmem>>, %arg14: memref<64x10xf32, #tpu.memory_space<vmem>>, %arg15: memref<1x10xf32, #tpu.memory_space<vmem>>, %arg16: memref<2x10xf32, #tpu.memory_space<vmem>>) attributes {dimension_semantics = [], scalar_prefetch = 0 : i64, scratch_operands = 0 : i64, tpu.core_type = #tpu.core_type<tc>} {
    %c0 = arith.constant 0 : index
    %c0_0 = arith.constant 0 : index
    %0 = vector.load %arg0[%c0, %c0_0] : memref<44x66xf32, #tpu.memory_space<vmem>>, vector<44x66xf32>
    %c0_1 = arith.constant 0 : index
    %c0_2 = arith.constant 0 : index
    %c0_3 = arith.constant 0 : index
    %1 = vector.load %arg1[%c0_1, %c0_2, %c0_3] : memref<3x66x80xf32, #tpu.memory_space<vmem>>, vector<3x66x80xf32>
    %c0_4 = arith.constant 0 : index
    %c0_5 = arith.constant 0 : index
    %2 = vector.load %arg2[%c0_4, %c0_5] : memref<1x80xf32, #tpu.memory_space<vmem>>, vector<1x80xf32>
    %c0_6 = arith.constant 0 : index
    %c0_7 = arith.constant 0 : index
    %3 = vector.load %arg3[%c0_6, %c0_7] : memref<20x41xf32, #tpu.memory_space<vmem>>, vector<20x41xf32>
    %4 = vector.extract_strided_slice %0 {offsets = [0, 0], sizes = [42, 66], strides = [1, 1]} : vector<44x66xf32> to vector<42x66xf32>
    %5 = vector.extract_strided_slice %1 {offsets = [0, 0, 0], sizes = [1, 66, 80], strides = [1, 1, 1]} : vector<3x66x80xf32> to vector<1x66x80xf32>
    %6 = vector.shape_cast %5 : vector<1x66x80xf32> to vector<66x80xf32>
    %cst = arith.constant dense<0.000000e+00> : vector<42x80xf32>
    %7 = tpu.matmul %4, %6, %cst {dimension_numbers = #tpu.dot_dimension_numbers<[1], [0], [0], [1], [0, 0, 1, 1], [], []>} : vector<42x66xf32>, vector<66x80xf32>, vector<42x80xf32> -> vector<42x80xf32>
    %8 = vector.extract_strided_slice %0 {offsets = [1, 0], sizes = [42, 66], strides = [1, 1]} : vector<44x66xf32> to vector<42x66xf32>
    %9 = vector.extract_strided_slice %1 {offsets = [1, 0, 0], sizes = [1, 66, 80], strides = [1, 1, 1]} : vector<3x66x80xf32> to vector<1x66x80xf32>
    %10 = vector.shape_cast %9 : vector<1x66x80xf32> to vector<66x80xf32>
    %cst_8 = arith.constant dense<0.000000e+00> : vector<42x80xf32>
    %11 = tpu.matmul %8, %10, %cst_8 {dimension_numbers = #tpu.dot_dimension_numbers<[1], [0], [0], [1], [0, 0, 1, 1], [], []>} : vector<42x66xf32>, vector<66x80xf32>, vector<42x80xf32> -> vector<42x80xf32>
    %12 = arith.addf %7, %11 : vector<42x80xf32>
    %13 = vector.extract_strided_slice %0 {offsets = [2, 0], sizes = [42, 66], strides = [1, 1]} : vector<44x66xf32> to vector<42x66xf32>
    %14 = vector.extract_strided_slice %1 {offsets = [2, 0, 0], sizes = [1, 66, 80], strides = [1, 1, 1]} : vector<3x66x80xf32> to vector<1x66x80xf32>
    %15 = vector.shape_cast %14 : vector<1x66x80xf32> to vector<66x80xf32>
    %cst_9 = arith.constant dense<0.000000e+00> : vector<42x80xf32>
    %16 = tpu.matmul %13, %15, %cst_9 {dimension_numbers = #tpu.dot_dimension_numbers<[1], [0], [0], [1], [0, 0, 1, 1], [], []>} : vector<42x66xf32>, vector<66x80xf32>, vector<42x80xf32> -> vector<42x80xf32>
    %17 = arith.addf %12, %16 : vector<42x80xf32>
    %18 = vector.broadcast %2 : vector<1x80xf32> to vector<42x80xf32>
    %19 = arith.addf %17, %18 : vector<42x80xf32>
    %cst_10 = arith.constant 0.000000e+00 : f32
    %20 = vector.broadcast %cst_10 : f32 to vector<42x80xf32>
    %21 = arith.maximumf %19, %20 : vector<42x80xf32>
    %22 = vector.extract_strided_slice %21 {offsets = [0, 0], sizes = [42, 76], strides = [1, 1]} : vector<42x80xf32> to vector<42x76xf32>
    %23 = vector.extract_strided_slice %21 {offsets = [0, 4], sizes = [42, 76], strides = [1, 1]} : vector<42x80xf32> to vector<42x76xf32>
    %24 = arith.maximumf %22, %23 : vector<42x76xf32>
    %25 = vector.extract_strided_slice %24 {offsets = [0, 0], sizes = [41, 76], strides = [1, 1]} : vector<42x76xf32> to vector<41x76xf32>
    %26 = vector.extract_strided_slice %24 {offsets = [1, 0], sizes = [41, 76], strides = [1, 1]} : vector<42x76xf32> to vector<41x76xf32>
    %27 = arith.maximumf %25, %26 : vector<41x76xf32>
    %cst_11 = arith.constant dense<0.000000e+00> : vector<20x76xf32>
    %28 = tpu.matmul %3, %27, %cst_11 {dimension_numbers = #tpu.dot_dimension_numbers<[1], [0], [0], [1], [0, 0, 1, 1], [], []>} : vector<20x41xf32>, vector<41x76xf32>, vector<20x76xf32> -> vector<20x76xf32>
    %c0_12 = arith.constant 0 : index
    %c0_13 = arith.constant 0 : index
    %c0_14 = arith.constant 0 : index
    %29 = vector.load %arg4[%c0_12, %c0_13, %c0_14] : memref<3x76x48xf32, #tpu.memory_space<vmem>>, vector<3x76x48xf32>
    %c0_15 = arith.constant 0 : index
    %c0_16 = arith.constant 0 : index
    %30 = vector.load %arg5[%c0_15, %c0_16] : memref<1x48xf32, #tpu.memory_space<vmem>>, vector<1x48xf32>
    %c0_17 = arith.constant 0 : index
    %c0_18 = arith.constant 0 : index
    %31 = vector.load %arg6[%c0_17, %c0_18] : memref<8x17xf32, #tpu.memory_space<vmem>>, vector<8x17xf32>
    %32 = vector.extract_strided_slice %28 {offsets = [0, 0], sizes = [18, 76], strides = [1, 1]} : vector<20x76xf32> to vector<18x76xf32>
    %33 = vector.extract_strided_slice %29 {offsets = [0, 0, 0], sizes = [1, 76, 48], strides = [1, 1, 1]} : vector<3x76x48xf32> to vector<1x76x48xf32>
    %34 = vector.shape_cast %33 : vector<1x76x48xf32> to vector<76x48xf32>
    %cst_19 = arith.constant dense<0.000000e+00> : vector<18x48xf32>
    %35 = tpu.matmul %32, %34, %cst_19 {dimension_numbers = #tpu.dot_dimension_numbers<[1], [0], [0], [1], [0, 0, 1, 1], [], []>} : vector<18x76xf32>, vector<76x48xf32>, vector<18x48xf32> -> vector<18x48xf32>
    %36 = vector.extract_strided_slice %28 {offsets = [1, 0], sizes = [18, 76], strides = [1, 1]} : vector<20x76xf32> to vector<18x76xf32>
    %37 = vector.extract_strided_slice %29 {offsets = [1, 0, 0], sizes = [1, 76, 48], strides = [1, 1, 1]} : vector<3x76x48xf32> to vector<1x76x48xf32>
    %38 = vector.shape_cast %37 : vector<1x76x48xf32> to vector<76x48xf32>
    %cst_20 = arith.constant dense<0.000000e+00> : vector<18x48xf32>
    %39 = tpu.matmul %36, %38, %cst_20 {dimension_numbers = #tpu.dot_dimension_numbers<[1], [0], [0], [1], [0, 0, 1, 1], [], []>} : vector<18x76xf32>, vector<76x48xf32>, vector<18x48xf32> -> vector<18x48xf32>
    %40 = arith.addf %35, %39 : vector<18x48xf32>
    %41 = vector.extract_strided_slice %28 {offsets = [2, 0], sizes = [18, 76], strides = [1, 1]} : vector<20x76xf32> to vector<18x76xf32>
    %42 = vector.extract_strided_slice %29 {offsets = [2, 0, 0], sizes = [1, 76, 48], strides = [1, 1, 1]} : vector<3x76x48xf32> to vector<1x76x48xf32>
    %43 = vector.shape_cast %42 : vector<1x76x48xf32> to vector<76x48xf32>
    %cst_21 = arith.constant dense<0.000000e+00> : vector<18x48xf32>
    %44 = tpu.matmul %41, %43, %cst_21 {dimension_numbers = #tpu.dot_dimension_numbers<[1], [0], [0], [1], [0, 0, 1, 1], [], []>} : vector<18x76xf32>, vector<76x48xf32>, vector<18x48xf32> -> vector<18x48xf32>
    %45 = arith.addf %40, %44 : vector<18x48xf32>
    %46 = vector.broadcast %30 : vector<1x48xf32> to vector<18x48xf32>
    %47 = arith.addf %45, %46 : vector<18x48xf32>
    %cst_22 = arith.constant 0.000000e+00 : f32
    %48 = vector.broadcast %cst_22 : f32 to vector<18x48xf32>
    %49 = arith.maximumf %47, %48 : vector<18x48xf32>
    %50 = vector.extract_strided_slice %49 {offsets = [0, 0], sizes = [18, 42], strides = [1, 1]} : vector<18x48xf32> to vector<18x42xf32>
    %51 = vector.extract_strided_slice %49 {offsets = [0, 6], sizes = [18, 42], strides = [1, 1]} : vector<18x48xf32> to vector<18x42xf32>
    %52 = arith.maximumf %50, %51 : vector<18x42xf32>
    %53 = vector.extract_strided_slice %52 {offsets = [0, 0], sizes = [17, 42], strides = [1, 1]} : vector<18x42xf32> to vector<17x42xf32>
    %54 = vector.extract_strided_slice %52 {offsets = [1, 0], sizes = [17, 42], strides = [1, 1]} : vector<18x42xf32> to vector<17x42xf32>
    %55 = arith.maximumf %53, %54 : vector<17x42xf32>
    %cst_23 = arith.constant dense<0.000000e+00> : vector<8x42xf32>
    %56 = tpu.matmul %31, %55, %cst_23 {dimension_numbers = #tpu.dot_dimension_numbers<[1], [0], [0], [1], [0, 0, 1, 1], [], []>} : vector<8x17xf32>, vector<17x42xf32>, vector<8x42xf32> -> vector<8x42xf32>
    %c0_24 = arith.constant 0 : index
    %c0_25 = arith.constant 0 : index
    %c0_26 = arith.constant 0 : index
    %57 = vector.load %arg7[%c0_24, %c0_25, %c0_26] : memref<3x42x16xf32, #tpu.memory_space<vmem>>, vector<3x42x16xf32>
    %c0_27 = arith.constant 0 : index
    %c0_28 = arith.constant 0 : index
    %58 = vector.load %arg8[%c0_27, %c0_28] : memref<1x16xf32, #tpu.memory_space<vmem>>, vector<1x16xf32>
    %c0_29 = arith.constant 0 : index
    %c0_30 = arith.constant 0 : index
    %59 = vector.load %arg9[%c0_29, %c0_30] : memref<2x5xf32, #tpu.memory_space<vmem>>, vector<2x5xf32>
    %60 = vector.extract_strided_slice %56 {offsets = [0, 0], sizes = [6, 42], strides = [1, 1]} : vector<8x42xf32> to vector<6x42xf32>
    %61 = vector.extract_strided_slice %57 {offsets = [0, 0, 0], sizes = [1, 42, 16], strides = [1, 1, 1]} : vector<3x42x16xf32> to vector<1x42x16xf32>
    %62 = vector.shape_cast %61 : vector<1x42x16xf32> to vector<42x16xf32>
    %cst_31 = arith.constant dense<0.000000e+00> : vector<6x16xf32>
    %63 = tpu.matmul %60, %62, %cst_31 {dimension_numbers = #tpu.dot_dimension_numbers<[1], [0], [0], [1], [0, 0, 1, 1], [], []>} : vector<6x42xf32>, vector<42x16xf32>, vector<6x16xf32> -> vector<6x16xf32>
    %64 = vector.extract_strided_slice %56 {offsets = [1, 0], sizes = [6, 42], strides = [1, 1]} : vector<8x42xf32> to vector<6x42xf32>
    %65 = vector.extract_strided_slice %57 {offsets = [1, 0, 0], sizes = [1, 42, 16], strides = [1, 1, 1]} : vector<3x42x16xf32> to vector<1x42x16xf32>
    %66 = vector.shape_cast %65 : vector<1x42x16xf32> to vector<42x16xf32>
    %cst_32 = arith.constant dense<0.000000e+00> : vector<6x16xf32>
    %67 = tpu.matmul %64, %66, %cst_32 {dimension_numbers = #tpu.dot_dimension_numbers<[1], [0], [0], [1], [0, 0, 1, 1], [], []>} : vector<6x42xf32>, vector<42x16xf32>, vector<6x16xf32> -> vector<6x16xf32>
    %68 = arith.addf %63, %67 : vector<6x16xf32>
    %69 = vector.extract_strided_slice %56 {offsets = [2, 0], sizes = [6, 42], strides = [1, 1]} : vector<8x42xf32> to vector<6x42xf32>
    %70 = vector.extract_strided_slice %57 {offsets = [2, 0, 0], sizes = [1, 42, 16], strides = [1, 1, 1]} : vector<3x42x16xf32> to vector<1x42x16xf32>
    %71 = vector.shape_cast %70 : vector<1x42x16xf32> to vector<42x16xf32>
    %cst_33 = arith.constant dense<0.000000e+00> : vector<6x16xf32>
    %72 = tpu.matmul %69, %71, %cst_33 {dimension_numbers = #tpu.dot_dimension_numbers<[1], [0], [0], [1], [0, 0, 1, 1], [], []>} : vector<6x42xf32>, vector<42x16xf32>, vector<6x16xf32> -> vector<6x16xf32>
    %73 = arith.addf %68, %72 : vector<6x16xf32>
    %74 = vector.broadcast %58 : vector<1x16xf32> to vector<6x16xf32>
    %75 = arith.addf %73, %74 : vector<6x16xf32>
    %cst_34 = arith.constant 0.000000e+00 : f32
    %76 = vector.broadcast %cst_34 : f32 to vector<6x16xf32>
    %77 = arith.maximumf %75, %76 : vector<6x16xf32>
    %78 = vector.extract_strided_slice %77 {offsets = [0, 0], sizes = [6, 8], strides = [1, 1]} : vector<6x16xf32> to vector<6x8xf32>
    %79 = vector.extract_strided_slice %77 {offsets = [0, 8], sizes = [6, 8], strides = [1, 1]} : vector<6x16xf32> to vector<6x8xf32>
    %80 = arith.maximumf %78, %79 : vector<6x8xf32>
    %81 = vector.extract_strided_slice %80 {offsets = [0, 0], sizes = [5, 8], strides = [1, 1]} : vector<6x8xf32> to vector<5x8xf32>
    %82 = vector.extract_strided_slice %80 {offsets = [1, 0], sizes = [5, 8], strides = [1, 1]} : vector<6x8xf32> to vector<5x8xf32>
    %83 = arith.maximumf %81, %82 : vector<5x8xf32>
    %cst_35 = arith.constant dense<0.000000e+00> : vector<2x8xf32>
    %84 = tpu.matmul %59, %83, %cst_35 {dimension_numbers = #tpu.dot_dimension_numbers<[1], [0], [0], [1], [0, 0, 1, 1], [], []>} : vector<2x5xf32>, vector<5x8xf32>, vector<2x8xf32> -> vector<2x8xf32>
    %c0_36 = arith.constant 0 : index
    %c0_37 = arith.constant 0 : index
    %85 = vector.load %arg10[%c0_36, %c0_37] : memref<8x128xf32, #tpu.memory_space<vmem>>, vector<8x128xf32>
    %cst_38 = arith.constant dense<0.000000e+00> : vector<2x128xf32>
    %86 = tpu.matmul %84, %85, %cst_38 {dimension_numbers = #tpu.dot_dimension_numbers<[1], [0], [0], [1], [0, 0, 1, 1], [], []>} : vector<2x8xf32>, vector<8x128xf32>, vector<2x128xf32> -> vector<2x128xf32>
    %c0_39 = arith.constant 0 : index
    %c0_40 = arith.constant 0 : index
    %87 = vector.load %arg11[%c0_39, %c0_40] : memref<1x128xf32, #tpu.memory_space<vmem>>, vector<1x128xf32>
    %88 = vector.broadcast %87 : vector<1x128xf32> to vector<2x128xf32>
    %89 = arith.addf %86, %88 : vector<2x128xf32>
    %cst_41 = arith.constant 0.000000e+00 : f32
    %90 = vector.broadcast %cst_41 : f32 to vector<2x128xf32>
    %91 = arith.maximumf %89, %90 : vector<2x128xf32>
    %c0_42 = arith.constant 0 : index
    %c0_43 = arith.constant 0 : index
    %92 = vector.load %arg12[%c0_42, %c0_43] : memref<128x64xf32, #tpu.memory_space<vmem>>, vector<128x64xf32>
    %cst_44 = arith.constant dense<0.000000e+00> : vector<2x64xf32>
    %93 = tpu.matmul %91, %92, %cst_44 {dimension_numbers = #tpu.dot_dimension_numbers<[1], [0], [0], [1], [0, 0, 1, 1], [], []>} : vector<2x128xf32>, vector<128x64xf32>, vector<2x64xf32> -> vector<2x64xf32>
    %c0_45 = arith.constant 0 : index
    %c0_46 = arith.constant 0 : index
    %94 = vector.load %arg13[%c0_45, %c0_46] : memref<1x64xf32, #tpu.memory_space<vmem>>, vector<1x64xf32>
    %95 = vector.broadcast %94 : vector<1x64xf32> to vector<2x64xf32>
    %96 = arith.addf %93, %95 : vector<2x64xf32>
    %cst_47 = arith.constant 0.000000e+00 : f32
    %97 = vector.broadcast %cst_47 : f32 to vector<2x64xf32>
    %98 = arith.maximumf %96, %97 : vector<2x64xf32>
    %c0_48 = arith.constant 0 : index
    %c0_49 = arith.constant 0 : index
    %99 = vector.load %arg14[%c0_48, %c0_49] : memref<64x10xf32, #tpu.memory_space<vmem>>, vector<64x10xf32>
    %cst_50 = arith.constant dense<0.000000e+00> : vector<2x10xf32>
    %100 = tpu.matmul %98, %99, %cst_50 {dimension_numbers = #tpu.dot_dimension_numbers<[1], [0], [0], [1], [0, 0, 1, 1], [], []>} : vector<2x64xf32>, vector<64x10xf32>, vector<2x10xf32> -> vector<2x10xf32>
    %c0_51 = arith.constant 0 : index
    %c0_52 = arith.constant 0 : index
    %101 = vector.load %arg15[%c0_51, %c0_52] : memref<1x10xf32, #tpu.memory_space<vmem>>, vector<1x10xf32>
    %102 = vector.broadcast %101 : vector<1x10xf32> to vector<2x10xf32>
    %103 = arith.addf %100, %102 : vector<2x10xf32>
    %cst_53 = arith.constant dense<0xFF800000> : vector<2xf32>
    %104 = vector.multi_reduction <maximumf>, %103, %cst_53 [1] : vector<2x10xf32> to vector<2xf32>
    %105 = vector.shape_cast %104 : vector<2xf32> to vector<2x1xf32>
    %106 = vector.broadcast %105 : vector<2x1xf32> to vector<2x10xf32>
    %107 = arith.subf %103, %106 : vector<2x10xf32>
    %108 = math.exp %107 : vector<2x10xf32>
    %cst_54 = arith.constant dense<0.000000e+00> : vector<2xf32>
    %109 = vector.multi_reduction <add>, %108, %cst_54 [1] : vector<2x10xf32> to vector<2xf32>
    %110 = vector.shape_cast %109 : vector<2xf32> to vector<2x1xf32>
    %111 = tpu.reciprocal %110 {approx = true} : vector<2x1xf32> -> vector<2x1xf32>
    %112 = arith.mulf %110, %111 : vector<2x1xf32>
    %cst_55 = arith.constant 2.000000e+00 : f32
    %113 = vector.broadcast %cst_55 : f32 to vector<2x1xf32>
    %114 = arith.subf %113, %112 : vector<2x1xf32>
    %115 = arith.mulf %111, %114 : vector<2x1xf32>
    %116 = vector.broadcast %115 : vector<2x1xf32> to vector<2x10xf32>
    %117 = arith.mulf %108, %116 : vector<2x10xf32>
    %c0_56 = arith.constant 0 : index
    %c0_57 = arith.constant 0 : index
    %118 = vector.load %arg16[%c0_56, %c0_57] : memref<2x10xf32, #tpu.memory_space<vmem>>, vector<2x10xf32>
    tpu.vector_store %arg16[%c0_56, %c0_57], %117 {strides = array<i32>} : memref<2x10xf32, #tpu.memory_space<vmem>>, vector<2x10xf32>,
    return
  }
}

</mosaic_0001>

<bundles_post_ra>
// kernel: conv_model_forward.1
= control target key start
LH: loop header
LB: loop body
LE: loop exit
PB: predicated region body
PF: predicated region fallthrough
CT: control target
= control target key end

     0   :  { %s3124_s0 = inlined_call_operand.vmem [shape: f32[44,66], index: 0, kind: input, shape index: {}]   ;;  %s3125_s1 = inlined_call_operand.vmem [shape: f32[3,66,80], index: 1, kind: input, shape index: {}]   ;;  %s3126_s2 = inlined_call_operand.vmem [shape: f32[1,80], index: 2, kind: input, shape index: {}]   ;;  %s3127_s3 = inlined_call_operand.vmem [shape: f32[20,41], index: 3, kind: input, shape index: {}]   ;;  %s3128_s4 = inlined_call_operand.vmem [shape: f32[3,76,48], index: 4, kind: input, shape index: {}]   ;;  %s3129_s5 = inlined_call_operand.vmem [shape: f32[1,48], index: 5, kind: input, shape index: {}]   ;;  %s3130_s6 = inlined_call_operand.vmem [shape: f32[8,17], index: 6, kind: input, shape index: {}]   ;;  %s3131_s7 = inlined_call_operand.vmem [shape: f32[3,42,16], index: 7, kind: input, shape index: {}]   ;;  %s3132_s8 = inlined_call_operand.vmem [shape: f32[1,16], index: 8, kind: input, shape index: {}]   ;;  %s3133_s9 = inlined_call_operand.vmem [shape: f32[2,5], index: 9, kind: input, shape index: {}]   ;;  %s3134_s10 = inlined_call_operand.vmem [shape: f32[8,128], index: 10, kind: input, shape index: {}]   ;;  %s3135_s11 = inlined_call_operand.vmem [shape: f32[1,128], index: 11, kind: input, shape index: {}]   ;;  %s3136_s12 = inlined_call_operand.vmem [shape: f32[128,64], index: 12, kind: input, shape index: {}]   ;;  %s3137_s13 = inlined_call_operand.vmem [shape: f32[1,64], index: 13, kind: input, shape index: {}]   ;;  %s3138_s14 = inlined_call_operand.vmem [shape: f32[64,10], index: 14, kind: input, shape index: {}]   ;;  %s3139_s15 = inlined_call_operand.vmem [shape: f32[1,10], index: 15, kind: input, shape index: {}]   ;;  %s3140_s16 = inlined_call_operand.hbm [shape: f32[2,10], index: 16, kind: output, shape index: {}]  }
   0x1   :  { %3142 = sst [smem:[#allocation5_spill]] %s3124_s0 }
   0x2   :  { %v69_v0 = vld [vmem:[%s3125_s1 + $0x48] sm:$0xff]  ;;  %v70_v1 = vld [vmem:[%s3125_s1 + $0x50] sm:$0xff]  ;;  %v71_v2 = vld [vmem:[%s3125_s1 + $0x58] sm:$0xff]  ;;  %s3143_s20 = sld [smem:[#allocation5_spill]]  ;;  %vm97_vm0 = vcmask 1046528   ;;  %vm109_vm1 = vcmask 539648  }
   0x3   :  { %v2216_v3 = vpack.c.bf16 %v70_v1, %v69_v0  ;;  %v72_v4 = vld [vmem:[%s3125_s1 + $0x60] sm:$0xff]  ;;  %v73_v6 = vld [vmem:[%s3125_s1 + $0x68] sm:$0xff]  ;;  %v74_v7 = vld [vmem:[%s3125_s1 + $0x70] sm:$0xff] }
   0x4   :  { %v2220_v5 = vpack.c.bf16 %v72_v4, %v71_v2  ;;  %v2224_v12 = vpack.c.bf16 %v74_v7, %v73_v6  ;;  %v75_v13 = vld [vmem:[%s3125_s1 + $0x78] sm:$0xff]  ;;  %v76_v14 = vld [vmem:[%s3125_s1 + $0x80] sm:$0xff] }
   0x5   :  { %2217 = vmatprep.subr.bf16.mxu0 %v2216_v3  ;;  %v2228_v16 = vpack.c.bf16 %v76_v14, %v75_v13 }
   0x6   :  { %2219 = vmatpush3.bf16.msra.mxu0 %v2216_v3 }
   0x7   :  { %2221 = vmatprep.subr.bf16.mxu0 %v2220_v5 }
   0x8   :  { %v2568_v8 = vld [vmem:[%s3143_s20] sm:$0xff]  ;;  %v2573_v9 = vld [vmem:[%s3143_s20 + $0x8] sm:$0xff]  ;;  %v2588_v17 = vld [vmem:[%s3143_s20 + $0x10] sm:$0xff] }
   0x9   :  { %v98_v10 = vrot.slane %v2568_v8, 1  ;;  %v99_v11 = vrot.slane %v2573_v9, 1 }
   0xa   :  { %2223 = vmatpush3.bf16.msra.mxu0 %v2220_v5 }
   0xb   :  { %v100_v15 = vsel %vm97_vm0, %v98_v10, %v99_v11  ;;  %2225 = vmatprep.subr.bf16.mxu0 %v2224_v12 }
   0xc   :  { %1927 = vmatprep.mubr.msk.f32.mxu0 %vm109_vm1, %v100_v15 }
   0xd   :  { %21 = vsyncpa [#allocation3], 0  ;;  %v2593_v18 = vld [vmem:[%s3143_s20 + $0x18] sm:$0xff]  ;;  %v77_v19 = vld [vmem:[%s3125_s1 + $0x88] sm:$0x3]  ;;  %vm122_vm2 = vcmask 1041408  }
   0xe   :  { %2227 = vmatpush3.bf16.msra.mxu0 %v2224_v12  ;;  %v60_v20 = vld [vmem:[%s3125_s1] sm:$0xff]  ;;  %v61_v21 = vld [vmem:[%s3125_s1 + $0x8] sm:$0xff]  ;;  %v101_v22 = vrot.slane %v2588_v17, 1  ;;  %v103_v23 = vrot.slane %v2593_v18, 1  ;;  %v62_v25 = vld [vmem:[%s3125_s1 + $0x10] sm:$0xff]  ;;  %v332_v52 = vrot.slane %v2568_v8, 2 }
   0xf   :  { %2229 = vmatprep.subr.bf16.mxu0 %v2228_v16  ;;  %v2609_v24 = vld [vmem:[%s3143_s20 + $0x20] sm:$0xff]  ;;  %v63_v26 = vld [vmem:[%s3125_s1 + $0x18] sm:$0xff]  ;;  %v2620_v27 = vld [vmem:[%s3143_s20 + $0x28] sm:$0xf]  ;;  %v2232_v28 = vpack.c.bf16 %v61_v21, %v60_v20  ;;  %v333_v53 = vrot.slane %v2573_v9, 2  ;;  %vm331_vm3 = vcmask 1045504  }
  0x10   :  { %v102_v29 = vsel %vm97_vm0, %v99_v11, %v101_v22  ;;  %v105_v30 = vrot.slane %v2609_v24, 1  ;;  %v2236_v31 = vpack.c.bf16 %v63_v26, %v62_v25  ;;  %v104_v32 = vsel %vm97_vm0, %v101_v22, %v103_v23  ;;  %v64_v34 = vld [vmem:[%s3125_s1 + $0x20] sm:$0xff]  ;;  %v65_v35 = vld [vmem:[%s3125_s1 + $0x28] sm:$0xff]  ;;  %v66_v39 = vld [vmem:[%s3125_s1 + $0x30] sm:$0xff]  ;;  %s2455_s30 = smov 124   ;;  %s2459_s28 = smov 122  }
  0x11   :  { %v107_v33 = vrot.slane %v2620_v27, 1  ;;  %v2240_v37 = vpack.c.bf16 %v65_v35, %v64_v34  ;;  %v67_v40 = vld [vmem:[%s3125_s1 + $0x38] sm:$0xff]  ;;  %v68_v42 = vld [vmem:[%s3125_s1 + $0x40] sm:$0x3]  ;;  %v78_v43 = vld [vmem:[%s3125_s1 + $0x90] sm:$0xff]  ;;  %v334_v57 = vsel %vm331_vm3, %v332_v52, %v333_v53  ;;  %v335_v58 = vrot.slane %v2588_v17, 2 }
  0x12   :  { %2231 = vmatpush3.bf16.msra.mxu0 %v2228_v16  ;;  %v106_v36 = vsel %vm97_vm0, %v103_v23, %v105_v30  ;;  %v2244_v41 = vpack.c.bf16 %v67_v40, %v66_v39  ;;  %v79_v44 = vld [vmem:[%s3125_s1 + $0x98] sm:$0xff]  ;;  %v80_v45 = vld [vmem:[%s3125_s1 + $0xa0] sm:$0xff]  ;;  %v81_v46 = vld [vmem:[%s3125_s1 + $0xa8] sm:$0xff]  ;;  %v337_v60 = vrot.slane %v2593_v18, 2  ;;  %v339_v62 = vrot.slane %v2609_v24, 2  ;;  %s2460_s27 = smov 120  }
  0x13   :  { %1925 = vmatprep.subr.msk.mxu0 %vm122_vm2, %v77_v19  ;;  %v108_v38 = vsel %vm97_vm0, %v105_v30, %v107_v33  ;;  %v2248_v47 = vpack.c.bf16 %v79_v44, %v78_v43  ;;  %v2252_v48 = vpack.c.bf16 %v81_v46, %v80_v45  ;;  %v82_v49 = vld [vmem:[%s3125_s1 + $0xb0] sm:$0xff]  ;;  %v83_v50 = vld [vmem:[%s3125_s1 + $0xb8] sm:$0xff]  ;;  %v84_v54 = vld [vmem:[%s3125_s1 + $0xc0] sm:$0xff]  ;;  %v336_v61 = vsel %vm331_vm3, %v333_v53, %v335_v58 }
  0x14   :  { %v2256_v51 = vpack.c.bf16 %v83_v50, %v82_v49  ;;  %v85_v55 = vld [vmem:[%s3125_s1 + $0xc8] sm:$0xff]  ;;  %v86_v59 = vld [vmem:[%s3125_s1 + $0xd0] sm:$0x3]  ;;  %v338_v63 = vsel %vm331_vm3, %v335_v58, %v337_v60  ;;  %v341_v0 = vrot.slane %v2620_v27, 2  ;;  %v340_v1 = vsel %vm331_vm3, %v337_v60, %v339_v62  ;;  %v1727_v3 = vld [vmem:[%s3126_s2] ss:$0 sm:$0xff] }
  0x15   :  { %v2260_v56 = vpack.c.bf16 %v85_v55, %v84_v54  ;;  %v2454_v14 = vmov 0.0|0.0   ;;  %vm2456_vm4 = vmmov 0   ;;  %v2457_v25 = vmov 0.0   ;;  %v641_v60 = vld [vmem:[%s3128_s4 + $0x58] sm:$0xff] }
  0x16   :  { %1926 = vmatpush3.msk.msra.mxu0 %vm122_vm2, %v77_v19  ;;  %v342_v2 = vsel %vm331_vm3, %v339_v62, %v341_v0  ;;  %2264 = vmatprep.subr.bf16.mxu1 %v2454_v14  ;;  %vm546_vm5 = vcmask 1040384   ;;  %vm2458_vm6 = vmmov 1   ;;  %v88_v62 = vld [vmem:[%s3127_s3] sm:$0xff]  ;;  %vm536_vm8 = vcmask 334848  }
  0x17   :  { %2233 = vmatprep.subr.bf16.mxu0 %v2232_v28  ;;  %1928 = vmatmul.mubr.msk.f32.vlgmr.msra.gmra.mrb[0].mxu0 %vm109_vm1, %v102_v29  ;;  %vm2272_vm7 = vmpackc.low %vm546_vm5, %vm2458_vm6  ;;  %vm677_vm9 = vcmask 1043456   ;;  %vm670_vm11 = vcmask 621568   ;;  %vm988_vm13 = vcmask 138240   ;;  %vm1087_vm14 = vcmask 343040  }
  0x18   :  { %2235 = vmatpush3.bf16.msra.mxu0 %v2232_v28  ;;  %1930 = vmatprep.mubr.msk.f32.mxu0 %vm109_vm1, %v104_v32  ;;  %vm2782_vm10 = vmpackc.low %vm677_vm9, %vm2458_vm6  ;;  %vm1336_vm15 = vcmask 1044480  }
  0x19   :  { %2237 = vmatprep.subr.bf16.mxu0 %v2236_v31  ;;  %2002 = vmatprep.mubr.msk.f32.mxu1 %vm2456_vm4, %v2457_v25  ;;  %vm2931_vm12 = vmpackc.low %vm122_vm2, %vm2458_vm6 }
  0x1b   :  { %1931 = vmatmul.mubr.msk.f32.gmra.mrb[2].mxu0 %vm109_vm1, %v106_v36 }
  0x1c   :  { %2239 = vmatpush3.bf16.msra.mxu0 %v2236_v31  ;;  %1933 = vmatprep.mubr.msk.f32.mxu0 %vm109_vm1, %v108_v38 }
  0x1d   :  { %2241 = vmatprep.subr.bf16.mxu0 %v2240_v37 }
  0x1f   :  { %1934 = vmatmul.mubr.msk.f32.gmra.mrb[4].mxu0 %vm109_vm1, %v107_v33 }
  0x20   :  { %2243 = vmatpush3.bf16.msra.mxu0 %v2240_v37  ;;  %1954 = vmatprep.mubr.msk.f32.mxu0 %vm109_vm1, %v2568_v8 }
  0x21   :  { %2245 = vmatprep.subr.bf16.mxu0 %v2244_v41 }
  0x24   :  { %2247 = vmatpush3.bf16.msra.mxu0 %v2244_v41 }
  0x25   :  { %1952 = vmatprep.subr.msk.mxu0 %vm122_vm2, %v68_v42 }
  0x28   :  { %1953 = vmatpush3.msk.msra.mxu0 %vm122_vm2, %v68_v42 }
  0x29   :  { %2249 = vmatprep.subr.bf16.mxu0 %v2248_v47  ;;  %1955 = vmatmul.mubr.msk.f32.vlgmr.msra.gmra.mrb[0].mxu0 %vm109_vm1, %v2573_v9 }
  0x2a   :  { %2251 = vmatpush3.bf16.msra.mxu0 %v2248_v47  ;;  %1957 = vmatprep.mubr.msk.f32.mxu0 %vm109_vm1, %v2588_v17 }
  0x2b   :  { %2253 = vmatprep.subr.bf16.mxu0 %v2252_v48 }
  0x2d   :  { %1958 = vmatmul.mubr.msk.f32.gmra.mrb[2].mxu0 %vm109_vm1, %v2593_v18 }
  0x2e   :  { %2255 = vmatpush3.bf16.msra.mxu0 %v2252_v48  ;;  %1960 = vmatprep.mubr.msk.f32.mxu0 %vm109_vm1, %v2609_v24 }
  0x2f   :  { %2257 = vmatprep.subr.bf16.mxu0 %v2256_v51 }
  0x31   :  { %1961 = vmatmul.mubr.msk.f32.gmra.mrb[4].mxu0 %vm109_vm1, %v2620_v27 }
  0x32   :  { %2259 = vmatpush3.bf16.msra.mxu0 %v2256_v51  ;;  %1981 = vmatprep.mubr.msk.f32.mxu0 %vm109_vm1, %v334_v57 }
  0x33   :  { %2261 = vmatprep.subr.bf16.mxu0 %v2260_v56 }
  0x36   :  { %2263 = vmatpush3.bf16.msra.mxu0 %v2260_v56 }
  0x37   :  { %1979 = vmatprep.subr.msk.mxu0 %vm122_vm2, %v86_v59 }
  0x3a   :  { %1980 = vmatpush3.msk.msra.mxu0 %vm122_vm2, %v86_v59  ;;  %v640_v59 = vld [vmem:[%s3128_s4 + $0x50] sm:$0xff]  ;;  %vm1602_vm2 = vcmask 523264  }
  0x3b   :  { %1982 = vmatmul.mubr.msk.f32.vlgmr.msra.gmra.mrb[0].mxu0 %vm109_vm1, %v336_v61  ;;  %2325 = vmatprep.subr.bf16.mxu0 %v2454_v14 }
  0x3c   :  { %1984 = vmatprep.mubr.msk.f32.mxu0 %vm109_vm1, %v338_v63  ;;  %v2275_v63 = vpack.c.bf16 %v641_v60, %v640_v59  ;;  %v658_v60 = vld [vmem:[%s3128_s4 + $0xe0] sm:$0xff] }
  0x3f   :  { %1985 = vmatmul.mubr.msk.f32.gmra.mrb[2].mxu0 %vm109_vm1, %v340_v1  ;;  %v643_v1 = vld [vmem:[%s3128_s4 + $0x68] sm:$0xff] }
  0x40   :  { %1987 = vmatprep.mubr.msk.f32.mxu0 %vm109_vm1, %v342_v2  ;;  %v89_v2 = vld [vmem:[%s3127_s3 + $0x8] sm:$0xff] }
  0x43   :  { %1988 = vmatmul.mubr.msk.f32.gmra.mrb[4].mxu0 %vm109_vm1, %v341_v0  ;;  %v642_v0 = vld [vmem:[%s3128_s4 + $0x60] sm:$0xff]  ;;  %vm1418_vm1 = vcmask 64512  }
  0x44   :  { %2119 = vmatprep.mubr.msk.f32.mxu0 %vm2456_vm4, %v2457_v25 }
 0x10e   :  { %v1983_v4 = vpop.f32.mrb[0].mxu0 }
 0x10f   :  { %v466_v5 = vadd.f32 %v1983_v4, %v1727_v3  ;;  %v424_v6 = vpop.f32.mrb[1].mxu0  ;;  %v644_v4 = vld [vmem:[%s3128_s4 + $0x70] sm:$0xff] }
 0x110   :  { %v465_v7 = vadd.f32 %v1727_v3, %v424_v6  ;;  %v90_v6 = vld [vmem:[%s3127_s3 + $0x10] sm:$0xf] }
 0x111   :  { %v472_v8 = vmax.f32 %v466_v5, 0.0  ;;  %v645_v5 = vld [vmem:[%s3128_s4 + $0x78] sm:$0xff] }
 0x112   :  { %v471_v9 = vmax.f32 %v465_v7, 0.0  ;;  %v1986_v10 = vpop.f32.mrb[2].mxu0  ;;  %v2281_v7 = vpack.c.bf16 %v645_v5, %v644_v4 }
 0x113   :  { %v434_v11 = vpop.f32.mrb[3].mxu0  ;;  %v468_v15 = vadd.f32 %v1986_v10, %v1727_v3 }
 0x114   :  { %v467_v12 = vadd.f32 %v1727_v3, %v434_v11  ;;  %v2411_v13 = vpack.i.bf16 %v472_v8, %v471_v9  ;;  %v648_v11 = vld [vmem:[%s3128_s4 + $0x90] sm:$0xff] }
 0x115   :  { %v474_v20 = vmax.f32 %v468_v15, 0.0 }
 0x116   :  { %2412 = vrot.lane.b32.xlu0 %v2411_v13, %s2455_s30  ;;  %v1989_v16 = vpop.f32.mrb[4].mxu0  ;;  %v473_v18 = vmax.f32 %v467_v12, 0.0  ;;  %v649_v12 = vld [vmem:[%s3128_s4 + $0x98] sm:$0xf] }
 0x117   :  { %v444_v17 = vpop.f32.mrb[5].mxu0  ;;  %v470_v22 = vadd.f32 %v1989_v16, %v1727_v3  ;;  %v2287_v13 = vpack.c.bf16 %v649_v12, %v648_v11 }
 0x118   :  { %v469_v19 = vadd.f32 %v1727_v3, %v444_v17  ;;  %v2278_v3 = vpack.c.bf16 %v643_v1, %v642_v0 }
 0x119   :  { %v476_v24 = vmax.f32 %v470_v22, 0.0 }
 0x11a   :  { %v475_v21 = vmax.f32 %v469_v19, 0.0  ;;  %487 = vrot.lane.b32.xlu0 %v473_v18, %s2455_s30  ;;  %v631_v19 = vld [vmem:[%s3128_s4 + $0x8] sm:$0xff] }
 0x11c   :  { %v2416_v23 = vpack.i.bf16 %v475_v21, %v474_v20 }
 0x11e   :  { %2417 = vrot.lane.b32.xlu1 %v2416_v23, %s2455_s30 }
 0x122   :  { %493 = vrot.lane.b32.xlu1 %v476_v24, %s2455_s30 }
 0x188   :  { %v2413_v26 = vpop.permute.xlu0 %2412 }
 0x189   :  { %v2415_v27 = vunpack.i.h.bf16 %v2413_v26  ;;  %v2414_v28 = vunpack.i.l.bf16 %v2413_v26 }
 0x18b   :  { %v502_v29 = vmax.f32 %v472_v8, %v2415_v27  ;;  %v501_v30 = vmax.f32 %v471_v9, %v2414_v28  ;;  %v646_v8 = vld [vmem:[%s3128_s4 + $0x80] sm:$0xff]  ;;  %v647_v9 = vld [vmem:[%s3128_s4 + $0x88] sm:$0xff]  ;;  %v632_v28 = vld [vmem:[%s3128_s4 + $0x10] sm:$0xff] }
 0x18c   :  { %v488_v31 = vpop.permute.xlu0 %487  ;;  %v2284_v10 = vpack.c.bf16 %v647_v9, %v646_v8 }
 0x18d   :  { %v514_v32 = vrot.slane %v502_v29, 1  ;;  %v513_v33 = vrot.slane %v501_v30, 1  ;;  %v503_v34 = vmax.f32 %v473_v18, %v488_v31  ;;  %v630_v18 = vld [vmem:[%s3128_s4] sm:$0xff] }
 0x18f   :  { %v516_v35 = vrot.slane %v503_v34, 1  ;;  %v515_v36 = vsel %vm97_vm0, %v513_v33, %v514_v32 }
 0x190   :  { %v2418_v37 = vpop.permute.xlu1 %2417  ;;  %v530_v41 = vmax.f32 %v501_v30, %v515_v36 }
 0x191   :  { %v2420_v38 = vunpack.i.h.bf16 %v2418_v37  ;;  %v2419_v39 = vunpack.i.l.bf16 %v2418_v37  ;;  %v517_v40 = vsel %vm97_vm0, %v514_v32, %v516_v35  ;;  %v634_v37 = vld [vmem:[%s3128_s4 + $0x20] sm:$0xff] }
 0x192   :  { %v531_v42 = vmax.f32 %v502_v29, %v517_v40  ;;  %v633_v29 = vld [vmem:[%s3128_s4 + $0x18] sm:$0xff] }
 0x193   :  { %v505_v43 = vmax.f32 %v475_v21, %v2420_v38  ;;  %v504_v44 = vmax.f32 %v474_v20, %v2419_v39  ;;  %v2291_v21 = vpack.c.bf16 %v631_v19, %v630_v18  ;;  %v635_v38 = vld [vmem:[%s3128_s4 + $0x28] sm:$0xff]  ;;  %v1744_v18 = vld [vmem:[%s3129_s5] ss:$0 sm:$0xff] }
 0x194   :  { %v494_v45 = vpop.permute.xlu1 %493  ;;  %v2265_v46 = vpack.c.bf16 %v531_v42, %v530_v41  ;;  %v2297_v41 = vpack.c.bf16 %v635_v38, %v634_v37  ;;  %v636_v42 = vld [vmem:[%s3128_s4 + $0x30] sm:$0xff]  ;;  %v1074_v37 = vld [vmem:[%s3131_s7 + $0x48] sm:$0xff] }
 0x195   :  { %v520_v47 = vrot.slane %v505_v43, 1  ;;  %v518_v48 = vrot.slane %v504_v44, 1  ;;  %v506_v49 = vmax.f32 %v476_v24, %v494_v45  ;;  %v638_v45 = vld [vmem:[%s3128_s4 + $0x40] sm:$0xff] }
 0x196   :  { %2266 = vmatpush3.bf16.msra.mxu1 %v2265_v46  ;;  %v639_v46 = vld [vmem:[%s3128_s4 + $0x48] sm:$0xf] }
 0x197   :  { %v521_v50 = vsel %vm97_vm0, %v518_v48, %v520_v47  ;;  %v522_v51 = vrot.slane %v506_v49, 1  ;;  %2267 = vmatprep.subr.bf16.mxu1 %v2454_v14  ;;  %v519_v52 = vsel %vm97_vm0, %v516_v35, %v518_v48  ;;  %v2294_v35 = vpack.c.bf16 %v633_v29, %v632_v28  ;;  %v650_v48 = vld [vmem:[%s3128_s4 + $0xa0] sm:$0xff] }
 0x198   :  { %v533_v53 = vmax.f32 %v504_v44, %v521_v50  ;;  %v532_v54 = vmax.f32 %v503_v34, %v519_v52  ;;  %v653_v52 = vld [vmem:[%s3128_s4 + $0xb8] sm:$0xff] }
 0x199   :  { %v523_v55 = vsel %vm97_vm0, %v520_v47, %v522_v51  ;;  %v535_v57 = vmax.f32 %v506_v49, %v522_v51  ;;  %v2303_v47 = vpack.c.bf16 %v639_v46, %v638_v45  ;;  %v651_v49 = vld [vmem:[%s3128_s4 + $0xa8] sm:$0xff]  ;;  %v652_v51 = vld [vmem:[%s3128_s4 + $0xb0] sm:$0xff] }
 0x19a   :  { %v534_v56 = vmax.f32 %v505_v43, %v523_v55  ;;  %v2268_v58 = vpack.c.bf16 %v533_v53, %v532_v54  ;;  %v637_v43 = vld [vmem:[%s3128_s4 + $0x38] sm:$0xff]  ;;  %v2307_v50 = vpack.c.bf16 %v651_v49, %v650_v48  ;;  %v2310_v53 = vpack.c.bf16 %v653_v52, %v652_v51  ;;  %v654_v54 = vld [vmem:[%s3128_s4 + $0xc0] sm:$0xff]  ;;  %v655_v55 = vld [vmem:[%s3128_s4 + $0xc8] sm:$0xff] }
 0x19b   :  { %v2300_v44 = vpack.c.bf16 %v637_v43, %v636_v42 }
 0x19c   :  { %2269 = vmatpush3.bf16.msra.mxu1 %v2268_v58  ;;  %v2271_v61 = vpack.c.bf16 %v535_v57, %v534_v56  ;;  %v2313_v56 = vpack.c.bf16 %v655_v55, %v654_v54  ;;  %v656_v57 = vld [vmem:[%s3128_s4 + $0xd0] sm:$0xff]  ;;  %v657_v58 = vld [vmem:[%s3128_s4 + $0xd8] sm:$0xff] }
 0x19d   :  { %2270 = vmatprep.subr.bf16.mxu1 %v2454_v14  ;;  %v2316_v59 = vpack.c.bf16 %v657_v58, %v656_v57  ;;  %v1065_v58 = vld [vmem:[%s3131_s7] sm:$0xff] }
 0x1a0   :  { %2273 = vmatpush3.bf16.msk.msra.mxu1 %vm2272_vm7, %v2271_v61  ;;  %v659_v61 = vld [vmem:[%s3128_s4 + $0xe8] sm:$0xf] }
 0x1a1   :  { %2274 = vmatprep.subr.bf16.mxu1 %v2454_v14 }
 0x1a3   :  { %2003 = vmatmul.mubr.msk.f32.vlgmr.msra.gmra.mrb[0].mxu1 %vm536_vm8, %v88_v62  ;;  %v2319_v62 = vpack.c.bf16 %v659_v61, %v658_v60  ;;  %v661_v61 = vld [vmem:[%s3130_s6] sm:$0xff] }
 0x1a4   :  { %2005 = vmatprep.mubr.msk.f32.mxu1 %vm2456_vm4, %v2457_v25  ;;  %2276 = vmatpush3.bf16.msra.mxu1 %v2275_v63 }
 0x1a5   :  { %2277 = vmatprep.subr.bf16.mxu1 %v2454_v14 }
 0x1a7   :  { %2006 = vmatmul.mubr.msk.f32.gmra.mrb[2].mxu1 %vm536_vm8, %v89_v2 }
 0x1a8   :  { %2008 = vmatprep.mubr.msk.f32.mxu1 %vm2456_vm4, %v2457_v25  ;;  %2279 = vmatpush3.bf16.msra.mxu1 %v2278_v3 }
 0x1a9   :  { %2280 = vmatprep.subr.bf16.mxu1 %v2454_v14 }
 0x1ab   :  { %2009 = vmatmul.mubr.msk.f32.gmra.mrb[4].mxu1 %vm536_vm8, %v90_v6 }
 0x1ac   :  { %2282 = vmatpush3.bf16.msra.mxu1 %v2281_v7  ;;  %2031 = vmatprep.mubr.msk.f32.mxu1 %vm2456_vm4, %v2457_v25 }
 0x1ad   :  { %2283 = vmatprep.subr.bf16.mxu1 %v2454_v14 }
 0x1b0   :  { %2285 = vmatpush3.bf16.msra.mxu1 %v2284_v10 }
 0x1b1   :  { %2286 = vmatprep.subr.bf16.mxu1 %v2454_v14 }
 0x1b4   :  { %2289 = vmatpush3.bf16.msk.msra.mxu1 %vm2782_vm10, %v2287_v13 }
 0x1b5   :  { %2290 = vmatprep.subr.bf16.mxu1 %v2454_v14 }
 0x276   :  { %v616_v16 = vpop.f32.mrb[0].mxu1 }
 0x277   :  { %v2004_v17 = vpop.f32.mrb[1].mxu1  ;;  %v665_v22 = vrot.slane %v616_v16, 1  ;;  %v850_v23 = vrot.slane %v616_v16, 2 }
 0x27a   :  { %v621_v20 = vpop.f32.mrb[2].mxu1 }
 0x27b   :  { %v666_v24 = vrot.slane %v621_v20, 1  ;;  %v851_v26 = vrot.slane %v621_v20, 2  ;;  %v2007_v27 = vpop.f32.mrb[3].mxu1 }
 0x27d   :  { %v667_v30 = vsel %vm97_vm0, %v665_v22, %v666_v24  ;;  %v2803_v31 = vsel %vm331_vm3, %v850_v23, %v851_v26 }
 0x27e   :  { %v2805_v32 = vpop.f32.mrb[4].mxu1  ;;  %2032 = vmatmul.mubr.msk.f32.vlgmr.msra.gmra.mrb[6].mxu1 %vm670_vm11, %v667_v30 }
 0x27f   :  { %v668_v33 = vrot.slane %v2805_v32, 1  ;;  %v853_v34 = vrot.slane %v2805_v32, 2  ;;  %2292 = vmatpush3.bf16.msra.mxu1 %v2291_v21  ;;  %2034 = vmatprep.mubr.msk.f32.mxu1 %vm2456_vm4, %v2457_v25  ;;  %v2010_v36 = vpop.f32.mrb[5].mxu1 }
 0x280   :  { %2293 = vmatprep.subr.bf16.mxu1 %v2454_v14  ;;  %v1073_v36 = vld [vmem:[%s3131_s7 + $0x40] sm:$0xff] }
 0x281   :  { %v669_v39 = vsel %vm97_vm0, %v666_v24, %v668_v33  ;;  %v854_v40 = vsel %vm331_vm3, %v851_v26, %v853_v34  ;;  %v2329_v38 = vpack.c.bf16 %v1074_v37, %v1073_v36  ;;  %v1410_v36 = vld [vmem:[%s3134_s10] sm:$0xff]  ;;  %vm1676_vm3 = vcmask 74752  }
 0x282   :  { %2035 = vmatmul.mubr.msk.f32.gmra.mrb[8].mxu1 %vm670_vm11, %v669_v39  ;;  %v1075_v39 = vld [vmem:[%s3131_s7 + $0x50] sm:$0xff]  ;;  %v1493_v37 = vld [vmem:[%s3136_s12] sm:$0xff] }
 0x283   :  { %2295 = vmatpush3.bf16.msra.mxu1 %v2294_v35  ;;  %2037 = vmatprep.mubr.msk.f32.mxu1 %vm2456_vm4, %v2457_v25 }
 0x284   :  { %2296 = vmatprep.subr.bf16.mxu1 %v2454_v14 }
 0x286   :  { %2038 = vmatmul.mubr.msk.f32.gmra.mrb[10].mxu1 %vm670_vm11, %v668_v33  ;;  %v1071_v33 = vld [vmem:[%s3131_s7 + $0x30] sm:$0xff] }
 0x287   :  { %2298 = vmatpush3.bf16.msra.mxu1 %v2297_v41  ;;  %2060 = vmatprep.mubr.msk.f32.mxu1 %vm2456_vm4, %v2457_v25 }
 0x288   :  { %2299 = vmatprep.subr.bf16.mxu1 %v2454_v14 }
 0x28b   :  { %2301 = vmatpush3.bf16.msra.mxu1 %v2300_v44 }
 0x28c   :  { %2302 = vmatprep.subr.bf16.mxu1 %v2454_v14 }
 0x28f   :  { %2305 = vmatpush3.bf16.msk.msra.mxu1 %vm2782_vm10, %v2303_v47 }
 0x290   :  { %2306 = vmatprep.subr.bf16.mxu1 %v2454_v14 }
 0x292   :  { %2061 = vmatmul.mubr.msk.f32.vlgmr.msra.gmra.mrb[12].mxu1 %vm670_vm11, %v616_v16 }
 0x293   :  { %2308 = vmatpush3.bf16.msra.mxu1 %v2307_v50  ;;  %2063 = vmatprep.mubr.msk.f32.mxu1 %vm2456_vm4, %v2457_v25 }
 0x294   :  { %2309 = vmatprep.subr.bf16.mxu1 %v2454_v14 }
 0x296   :  { %2064 = vmatmul.mubr.msk.f32.gmra.mrb[14].mxu1 %vm670_vm11, %v621_v20 }
 0x297   :  { %2311 = vmatpush3.bf16.msra.mxu1 %v2310_v53  ;;  %2066 = vmatprep.mubr.msk.f32.mxu1 %vm2456_vm4, %v2457_v25 }
 0x298   :  { %2312 = vmatprep.subr.bf16.mxu1 %v2454_v14 }
 0x29a   :  { %2067 = vmatmul.mubr.msk.f32.gmra.mrb[16].mxu1 %vm670_vm11, %v2805_v32 }
 0x29b   :  { %2314 = vmatpush3.bf16.msra.mxu1 %v2313_v56  ;;  %2089 = vmatprep.mubr.msk.f32.mxu1 %vm2456_vm4, %v2457_v25 }
 0x29c   :  { %2315 = vmatprep.subr.bf16.mxu1 %v2454_v14 }
 0x29f   :  { %2317 = vmatpush3.bf16.msra.mxu1 %v2316_v59  ;;  %v1066_v59 = vld [vmem:[%s3131_s7 + $0x8] sm:$0xff] }
 0x2a0   :  { %2318 = vmatprep.subr.bf16.mxu1 %v2454_v14 }
 0x2a3   :  { %2321 = vmatpush3.bf16.msk.msra.mxu1 %vm2782_vm10, %v2319_v62  ;;  %v2336_v62 = vpack.c.bf16 %v1066_v59, %v1065_v58 }
 0x2a4   :  { %2322 = vmatprep.subr.bf16.mxu1 %v2454_v14 }
 0x2a6   :  { %2090 = vmatmul.mubr.msk.f32.vlgmr.msra.gmra.mrb[18].mxu1 %vm670_vm11, %v2803_v31 }
 0x2a7   :  { %2092 = vmatprep.mubr.msk.f32.mxu1 %vm2456_vm4, %v2457_v25 }
 0x2aa   :  { %2093 = vmatmul.mubr.msk.f32.gmra.mrb[20].mxu1 %vm670_vm11, %v854_v40  ;;  %v1076_v40 = vld [vmem:[%s3131_s7 + $0x58] sm:$0x3] }
 0x2ab   :  { %2095 = vmatprep.mubr.msk.f32.mxu1 %vm2456_vm4, %v2457_v25  ;;  %v2332_v41 = vpack.c.bf16 %v1076_v40, %v1075_v39  ;;  %v1495_v39 = vld [vmem:[%s3136_s12 + $0x10] sm:$0xff] }
 0x2ae   :  { %2096 = vmatmul.mubr.msk.f32.gmra.mrb[22].mxu1 %vm670_vm11, %v853_v34  ;;  %v1072_v34 = vld [vmem:[%s3131_s7 + $0x38] sm:$0xff] }
 0x2af   :  { %2104 = vmatprep.mubr.msk.f32.mxu1 %vm2456_vm4, %v2457_v25  ;;  %v2326_v35 = vpack.c.bf16 %v1072_v34, %v1071_v33 }
 0x2b1   :  { %2327 = vmatpush3.bf16.msra.mxu0 %v2326_v35  ;;  %v1084_v35 = vld [vmem:[%s3133_s9] sm:$0x3] }
 0x2b2   :  { %2328 = vmatprep.subr.bf16.mxu0 %v2454_v14 }
 0x2b5   :  { %2330 = vmatpush3.bf16.msra.mxu0 %v2329_v38  ;;  %v1494_v38 = vld [vmem:[%s3136_s12 + $0x8] sm:$0xff] }
 0x2b6   :  { %2331 = vmatprep.subr.bf16.mxu0 %v2454_v14  ;;  %v2356_v40 = vpack.c.bf16 %v1494_v38, %v1493_v37 }
 0x2b9   :  { %2334 = vmatpush3.bf16.msk.msra.mxu0 %vm2931_vm12, %v2332_v41  ;;  %v1496_v41 = vld [vmem:[%s3136_s12 + $0x18] sm:$0xff] }
 0x2ba   :  { %2345 = vmatprep.subr.bf16.mxu0 %v2454_v14  ;;  %v2359_v42 = vpack.c.bf16 %v1496_v41, %v1495_v39 }
 0x351   :  { %v747_v63 = vpop.f32.mrb[6].mxu1 }
 0x352   :  { %v2033_v0 = vpop.f32.mrb[7].mxu1 }
 0x353   :  { %v1068_v0 = vld [vmem:[%s3131_s7 + $0x18] sm:$0xff] }
 0x355   :  { %v752_v1 = vpop.f32.mrb[8].mxu1 }
 0x356   :  { %v2036_v2 = vpop.f32.mrb[9].mxu1 }
 0x357   :  { %v1069_v2 = vld [vmem:[%s3131_s7 + $0x20] sm:$0xff] }
 0x359   :  { %v757_v3 = vpop.f32.mrb[10].mxu1 }
 0x35a   :  { %v2039_v4 = vpop.f32.mrb[11].mxu1 }
 0x365   :  { %v836_v5 = vpop.f32.mrb[12].mxu1 }
 0x366   :  { %v837_v6 = vadd.f32 %v836_v5, %v747_v63  ;;  %v2062_v7 = vpop.f32.mrb[13].mxu1  ;;  %v1067_v63 = vld [vmem:[%s3131_s7 + $0x10] sm:$0xff]  ;;  %v1077_v5 = vld [vmem:[%s3131_s7 + $0x60] sm:$0xff] }
 0x369   :  { %v841_v8 = vpop.f32.mrb[14].mxu1 }
 0x36a   :  { %v842_v9 = vadd.f32 %v841_v8, %v752_v1  ;;  %v2065_v10 = vpop.f32.mrb[15].mxu1  ;;  %v2339_v1 = vpack.c.bf16 %v1068_v0, %v1067_v63  ;;  %v1587_v63 = vld [vmem:[%s3138_s14] sm:$0xff]  ;;  %v1588_v0 = vld [vmem:[%s3138_s14 + $0x8] sm:$0xff] }
 0x36d   :  { %v846_v11 = vpop.f32.mrb[16].mxu1 }
 0x36e   :  { %v847_v12 = vadd.f32 %v846_v11, %v757_v3  ;;  %v2068_v13 = vpop.f32.mrb[17].mxu1  ;;  %v1070_v3 = vld [vmem:[%s3131_s7 + $0x28] sm:$0x3]  ;;  %v1079_v11 = vld [vmem:[%s3131_s7 + $0x70] sm:$0xff] }
 0x36f   :  { %v2342_v4 = vpack.c.bf16 %v1070_v3, %v1069_v2  ;;  %v1590_v2 = vld [vmem:[%s3138_s14 + $0x18] sm:$0xff] }
 0x379   :  { %v930_v15 = vpop.f32.mrb[18].mxu1 }
 0x37a   :  { %v944_v16 = vadd.f32 %v930_v15, %v837_v6  ;;  %v2091_v17 = vpop.f32.mrb[19].mxu1  ;;  %v1078_v6 = vld [vmem:[%s3131_s7 + $0x68] sm:$0xff]  ;;  %v1081_v15 = vld [vmem:[%s3131_s7 + $0x80] sm:$0xff] }
 0x37b   :  { %v2346_v8 = vpack.c.bf16 %v1078_v6, %v1077_v5  ;;  %v1592_v5 = vld [vmem:[%s3138_s14 + $0x28] sm:$0xff] }
 0x37c   :  { %v953_v20 = vadd.f32 %v1744_v18, %v944_v16  ;;  %v1082_v16 = vld [vmem:[%s3131_s7 + $0x88] sm:$0x3] }
 0x37d   :  { %v935_v19 = vpop.f32.mrb[20].mxu1  ;;  %v2352_v17 = vpack.c.bf16 %v1082_v16, %v1081_v15 }
 0x37e   :  { %v945_v21 = vadd.f32 %v935_v19, %v842_v9  ;;  %v2094_v22 = vpop.f32.mrb[21].mxu1  ;;  %v956_v26 = vmax.f32 %v953_v20, 0.0 }
 0x380   :  { %v954_v23 = vadd.f32 %v1744_v18, %v945_v21 }
 0x381   :  { %v940_v24 = vpop.f32.mrb[22].mxu1 }
 0x382   :  { %v957_v27 = vmax.f32 %v954_v23, 0.0  ;;  %v946_v28 = vadd.f32 %v940_v24, %v847_v12  ;;  %v2097_v29 = vpop.f32.mrb[23].mxu1  ;;  %v1080_v12 = vld [vmem:[%s3131_s7 + $0x78] sm:$0xff]  ;;  %v1753_v24 = vld [vmem:[%s3132_s8] ss:$0 sm:$0xff] }
 0x383   :  { %v2349_v13 = vpack.c.bf16 %v1080_v12, %v1079_v11  ;;  %v1593_v12 = vld [vmem:[%s3138_s14 + $0x30] sm:$0xff] }
 0x384   :  { %v955_v30 = vadd.f32 %v1744_v18, %v946_v28  ;;  %v2421_v31 = vpack.i.bf16 %v957_v27, %v956_v26 }
 0x386   :  { %v958_v32 = vmax.f32 %v955_v30, 0.0  ;;  %2422 = vrot.lane.b32.xlu0 %v2421_v31, %s2459_s28 }
 0x388   :  { %966 = vrot.lane.b32.xlu1 %v958_v32, %s2459_s28 }
 0x3f8   :  { %v2423_v43 = vpop.permute.xlu0 %2422 }
 0x3f9   :  { %v2425_v44 = vunpack.i.h.bf16 %v2423_v43  ;;  %v2424_v45 = vunpack.i.l.bf16 %v2423_v43  ;;  %v1497_v43 = vld [vmem:[%s3136_s12 + $0x20] sm:$0xff] }
 0x3fa   :  { %v967_v46 = vpop.permute.xlu1 %966 }
 0x3fb   :  { %v972_v47 = vmax.f32 %v957_v27, %v2425_v44  ;;  %v971_v48 = vmax.f32 %v956_v26, %v2424_v45  ;;  %v973_v49 = vmax.f32 %v958_v32, %v967_v46  ;;  %v1498_v44 = vld [vmem:[%s3136_s12 + $0x28] sm:$0xff]  ;;  %v1499_v46 = vld [vmem:[%s3136_s12 + $0x30] sm:$0xff] }
 0x3fc   :  { %v2362_v45 = vpack.c.bf16 %v1498_v44, %v1497_v43 }
 0x3fd   :  { %v978_v50 = vrot.slane %v972_v47, 1  ;;  %v977_v51 = vrot.slane %v971_v48, 1  ;;  %v980_v52 = vrot.slane %v973_v49, 1 }
 0x3ff   :  { %v979_v53 = vsel %vm97_vm0, %v977_v51, %v978_v50  ;;  %v981_v54 = vsel %vm97_vm0, %v978_v50, %v980_v52  ;;  %v987_v60 = vmax.f32 %v973_v49, %v980_v52  ;;  %vm1332_vm0 = vcmask 39936   ;;  %v1501_v49 = vld [vmem:[%s3136_s12 + $0x40] sm:$0xff]  ;;  %v1502_v50 = vld [vmem:[%s3136_s12 + $0x48] sm:$0xff]  ;;  %v1503_v52 = vld [vmem:[%s3136_s12 + $0x50] sm:$0xff] }
 0x400   :  { %v985_v55 = vmax.f32 %v971_v48, %v979_v53  ;;  %v986_v56 = vmax.f32 %v972_v47, %v981_v54  ;;  %v1500_v47 = vld [vmem:[%s3136_s12 + $0x38] sm:$0xff]  ;;  %v2368_v51 = vpack.c.bf16 %v1502_v50, %v1501_v49 }
 0x401   :  { %v2365_v48 = vpack.c.bf16 %v1500_v47, %v1499_v46  ;;  %v1504_v53 = vld [vmem:[%s3136_s12 + $0x58] sm:$0xff] }
 0x402   :  { %v2323_v57 = vpack.c.bf16 %v986_v56, %v985_v55  ;;  %v2371_v54 = vpack.c.bf16 %v1504_v53, %v1503_v52  ;;  %v1505_v55 = vld [vmem:[%s3136_s12 + $0x60] sm:$0xff]  ;;  %v1506_v56 = vld [vmem:[%s3136_s12 + $0x68] sm:$0xff] }
 0x404   :  { %2324 = vmatpush3.bf16.msra.mxu1 %v2323_v57  ;;  %v2374_v57 = vpack.c.bf16 %v1506_v56, %v1505_v55 }
 0x405   :  { %2102 = vmatprep.subr.mxu1 %v2457_v25 }
 0x408   :  { %2103 = vmatpush3.msk.msra.mxu1 %vm546_vm5, %v987_v60  ;;  %v1507_v60 = vld [vmem:[%s3136_s12 + $0x70] sm:$0xff] }
 0x409   :  { %2105 = vmatmul.mubr.msk.f32.vlgmr.msra.gmra.mrb[24].mxu1 %vm988_vm13, %v661_v61  ;;  %2335 = vmatprep.subr.bf16.mxu1 %v2454_v14  ;;  %v1508_v61 = vld [vmem:[%s3136_s12 + $0x78] sm:$0xff] }
 0x40a   :  { %2337 = vmatpush3.bf16.msra.mxu1 %v2336_v62  ;;  %2134 = vmatprep.mubr.msk.f32.mxu1 %vm2456_vm4, %v2457_v25  ;;  %v2377_v62 = vpack.c.bf16 %v1508_v61, %v1507_v60 }
 0x40b   :  { %2338 = vmatprep.subr.bf16.mxu1 %v2454_v14 }
 0x40e   :  { %2340 = vmatpush3.bf16.msra.mxu1 %v2339_v1  ;;  %v2380_v1 = vpack.c.bf16 %v1588_v0, %v1587_v63 }
 0x40f   :  { %2341 = vmatprep.subr.bf16.mxu1 %v2454_v14 }
 0x412   :  { %2344 = vmatpush3.bf16.msk.msra.mxu1 %vm2931_vm12, %v2342_v4  ;;  %v1591_v4 = vld [vmem:[%s3138_s14 + $0x20] sm:$0xff] }
 0x413   :  { %2157 = vmatprep.subr.mxu1 %v2457_v25  ;;  %v2386_v6 = vpack.c.bf16 %v1592_v5, %v1591_v4 }
 0x4dc   :  { %v1061_v7 = vpop.f32.mrb[24].mxu1 }
 0x4dd   :  { %v1086_v9 = vrot.slane %v1061_v7, 1  ;;  %v2106_v10 = vpop.f32.mrb[25].mxu1  ;;  %2135 = vmatmul.mubr.msk.f32.vlgmr.msra.gmra.mrb[26].mxu1 %vm1087_vm14, %v1061_v7  ;;  %v1238_v18 = vrot.slane %v1061_v7, 2  ;;  %v1756_v7 = vld [vmem:[%s3135_s11] ss:$0 sm:$0xff] }
 0x4de   :  { %2159 = vmatprep.mubr.msk.f32.mxu1 %vm2456_vm4, %v2457_v25  ;;  %2158 = vmatpush3.msra.mxu1 %v1410_v36 }
 0x4df   :  { %2120 = vmatmul.mubr.msk.f32.vlgmr.msra.gmra.mrb[6].mxu0 %vm1087_vm14, %v1086_v9  ;;  %2379 = vmatprep.subr.bf16.mxu1 %v2454_v14 }
 0x4e0   :  { %2347 = vmatpush3.bf16.msra.mxu0 %v2346_v8  ;;  %2149 = vmatprep.mubr.msk.f32.mxu0 %vm2456_vm4, %v2457_v25 }
 0x4e1   :  { %2348 = vmatprep.subr.bf16.mxu0 %v2454_v14 }
 0x4e4   :  { %2350 = vmatpush3.bf16.msra.mxu0 %v2349_v13  ;;  %v1594_v13 = vld [vmem:[%s3138_s14 + $0x38] sm:$0xff] }
 0x4e5   :  { %2351 = vmatprep.subr.bf16.mxu0 %v2454_v14  ;;  %v2389_v15 = vpack.c.bf16 %v1594_v13, %v1593_v12 }
 0x4e8   :  { %2354 = vmatpush3.bf16.msk.msra.mxu0 %vm2931_vm12, %v2352_v17 }
 0x4e9   :  { %2152 = vmatprep.subr.mxu0 %v2457_v25 }
 0x4eb   :  { %2150 = vmatmul.mubr.msk.f32.vlgmr.msra.gmra.mrb[8].mxu0 %vm1087_vm14, %v1238_v18 }
 0x4ec   :  { %2154 = vmatprep.mubr.msk.f32.mxu0 %vm2456_vm4, %v2457_v25 }
 0x5b0   :  { %v1234_v19 = vpop.f32.mrb[26].mxu1 }
 0x5b1   :  { %v2136_v20 = vpop.f32.mrb[27].mxu1 }
 0x5b2   :  { %v1159_v21 = vpop.f32.mrb[6].mxu0  ;;  %v1759_v20 = vld [vmem:[%s3139_s15] ss:$0 sm:$0xff] }
 0x5b3   :  { %v1235_v22 = vadd.f32 %v1234_v19, %v1159_v21  ;;  %v2121_v23 = vpop.f32.mrb[7].mxu0 }
 0x5be   :  { %v1310_v26 = vpop.f32.mrb[8].mxu0 }
 0x5bf   :  { %v1314_v27 = vadd.f32 %v1310_v26, %v1235_v22  ;;  %v2151_v28 = vpop.f32.mrb[9].mxu0 }
 0x5c1   :  { %v1321_v29 = vadd.f32 %v1753_v24, %v1314_v27 }
 0x5c3   :  { %v1322_v30 = vmax.f32 %v1321_v29, 0.0 }
 0x5c5   :  { %1324 = vrot.lane.b32.xlu0 %v1322_v30, %s2460_s27 }
 0x637   :  { %v1325_v31 = vpop.permute.xlu0 %1324 }
 0x638   :  { %v1327_v32 = vmax.f32 %v1322_v30, %v1325_v31 }
 0x63a   :  { %v1329_v33 = vrot.slane %v1327_v32, 1 }
 0x63c   :  { %v1331_v34 = vmax.f32 %v1327_v32, %v1329_v33 }
 0x63e   :  { %2153 = vmatpush3.msk.msra.mxu0 %vm1336_vm15, %v1331_v34 }
 0x63f   :  { %2155 = vmatmul.mubr.msk.f32.vlgmr.msra.gmra.mrb[10].mxu0 %vm1332_vm0, %v1084_v35  ;;  %2355 = vmatprep.subr.bf16.mxu0 %v2454_v14 }
 0x640   :  { %2194 = vmatprep.mubr.msk.f32.mxu0 %vm2456_vm4, %v2457_v25  ;;  %2357 = vmatpush3.bf16.msra.mxu0 %v2356_v40 }
 0x641   :  { %2358 = vmatprep.subr.bf16.mxu0 %v2454_v14 }
 0x644   :  { %2360 = vmatpush3.bf16.msra.mxu0 %v2359_v42 }
 0x645   :  { %2361 = vmatprep.subr.bf16.mxu0 %v2454_v14 }
 0x648   :  { %2363 = vmatpush3.bf16.msra.mxu0 %v2362_v45 }
 0x649   :  { %2364 = vmatprep.subr.bf16.mxu0 %v2454_v14 }
 0x64c   :  { %2366 = vmatpush3.bf16.msra.mxu0 %v2365_v48 }
 0x64d   :  { %2367 = vmatprep.subr.bf16.mxu0 %v2454_v14 }
 0x650   :  { %2369 = vmatpush3.bf16.msra.mxu0 %v2368_v51 }
 0x651   :  { %2370 = vmatprep.subr.bf16.mxu0 %v2454_v14 }
 0x654   :  { %2372 = vmatpush3.bf16.msra.mxu0 %v2371_v54 }
 0x655   :  { %2373 = vmatprep.subr.bf16.mxu0 %v2454_v14 }
 0x658   :  { %2375 = vmatpush3.bf16.msra.mxu0 %v2374_v57 }
 0x659   :  { %2376 = vmatprep.subr.bf16.mxu0 %v2454_v14 }
 0x65c   :  { %2378 = vmatpush3.bf16.msra.mxu0 %v2377_v62 }
 0x712   :  { %v1406_v58 = vpop.f32.mrb[10].mxu0 }
 0x713   :  { %2160 = vmatmul.mubr.msk.f32.vlgmr.msra.gmra.mrb[28].mxu1 %vm1418_vm1, %v1406_v58  ;;  %v2156_v59 = vpop.f32.mrb[11].mxu0 }
 0x714   :  { %2213 = vmatprep.mubr.msk.f32.mxu1 %vm2456_vm4, %v2457_v25  ;;  %v1589_v25 = vld [vmem:[%s3138_s14 + $0x10] sm:$0xff]  ;;  %2381 = vmatpush3.bf16.msra.mxu1 %v2380_v1 }
 0x715   :  { %v2383_v3 = vpack.c.bf16 %v1590_v2, %v1589_v25  ;;  %2382 = vmatprep.subr.bf16.mxu1 %v2454_v14 }
 0x718   :  { %2384 = vmatpush3.bf16.msra.mxu1 %v2383_v3 }
 0x719   :  { %2385 = vmatprep.subr.bf16.mxu1 %v2454_v14 }
 0x71c   :  { %2387 = vmatpush3.bf16.msra.mxu1 %v2386_v6 }
 0x71d   :  { %2388 = vmatprep.subr.bf16.mxu1 %v2454_v14  ;;  %v1758_v14 = vld [vmem:[%s3137_s13] ss:$0 sm:$0xff]  ;;  %s2461_s13 = smov [#allocation2]  }
 0x71e   :  { %s1698_s14 = sshll.u32 %s2461_s13, 4  ;;  %s1699_s14 = int_to_ptr.vmem [resolvable:$true] %s1698_s14 }
 0x71f   :  { %s2430_s15 = scalar_lea.vmem %s1699_s14, 32  ;;  %p2435_p1 = scmp.lt.s32.totalorder %s1699_s14, %s1699_s14 }
 0x720   :  { %2390 = vmatpush3.bf16.msra.mxu1 %v2389_v15  ;;  %p2431_p0 = scmp.ne.s32.totalorder %s1699_s14, %s2430_s15  ;;  %p2436_p2 = scmp.lt.s32.totalorder %s2430_s15, %s2430_s15 }
 0x722   :  { %p2437_p3 = por %p2436_p2, %p2435_p1 }
 0x724   :  { %p2438_p4 = pnand %p2437_p3, %p2431_p0 }
 0x7e6   :  { %v1488_v8 = vpop.f32.mrb[28].mxu1 }
 0x7e7   :  { %v1489_v9 = vadd.f32 %v1756_v7, %v1488_v8  ;;  %v2161_v10 = vpop.f32.mrb[29].mxu1 }
 0x7e9   :  { %v1492_v11 = vmax.f32 %v1489_v9, 0.0 }
 0x7eb   :  { %2195 = vmatmul.mubr.f32.vlgmr.msra.gmra.mrb[12].mxu0 %v1492_v11 }
 0x8be   :  { %v1582_v16 = vpop.f32.mrb[12].mxu0 }
 0x8bf   :  { %v1583_v17 = vadd.f32 %v1758_v14, %v1582_v16  ;;  %v2196_v18 = vpop.f32.mrb[13].mxu0 }
 0x8c1   :  { %v1586_v19 = vmax.f32 %v1583_v17, 0.0 }
 0x8c3   :  { %2214 = vmatmul.mubr.msk.f32.vlgmr.msra.gmra.mrb[30].mxu1 %vm1602_vm2, %v1586_v19 }
 0x996   :  { %v1672_v21 = vpop.f32.mrb[30].mxu1 }
 0x997   :  { %v1673_v22 = vadd.f32 %v1759_v20, %v1672_v21  ;;  %v2215_v23 = vpop.f32.mrb[31].mxu1 }
 0x999   :  { %v1677_v24 = vsel %vm1676_vm3, %v1673_v22, -inf }
 0x99a   :  { %1678 = vmax.xlane.f32.xlu1 %v1677_v24 }
 0xa27   :  { %v1679_v26 = vpop.xlane.xlu1 %1678 }
 0xa28   :  { %v1680_v27 = vsub.f32 %v1673_v22, %v1679_v26 }
 0xa2a   :  { %v1681_v28 = vmul.f32 1.442695, %v1680_v27 }
 0xa2c   :  { %2426 = vpow2.f32 %v1681_v28 }
 0xa36   :  { %v2427_v29 = vpop.eup %2426 }
 0xa37   :  { %v1683_v30 = vsel %vm1676_vm3, %v2427_v29, 0.0 }
 0xa38   :  { %1684 = vadd.xlane.f32.xlu0 %v1683_v30 }
 0xac5   :  { %v1685_v31 = vpop.xlane.xlu0 %1684 }
 0xac6   :  { %2428 = vrcp.f32 %v1685_v31 }
 0xad0   :  { %v2429_v32 = vpop.eup %2428 }
 0xad1   :  { %v1687_v33 = vmul.f32 %v2429_v32, %v1685_v31 }
 0xad3   :  { %v1688_v34 = vsub.f32 2.0, %v1687_v33 }
 0xad5   :  { %v1689_v35 = vmul.f32 %v2429_v32, %v1688_v34 }
 0xad7   :  { %v1690_v36 = vmul.f32 %v2427_v29, %v1689_v35 }
 0xad9   :  { %1691 = vst.msk [vmem:[#allocation2] sm:$0x3] %vm1676_vm3, %v1690_v36 }
 0xada   :  { %2441 = shalt.err (!%p2438_p4)
}
 0xadb   :  { %s2442_s9 = scalar_lea.hbm %s3140_s16, 32 }
 0xadc   :  { %p2443_p5 = scmp.ne.s32.totalorder %s3140_s16, %s2442_s9  ;;  %p2446_p6 = scmp.lt.u32.totalorder %s2442_s9, %s3140_s16 }
 0xade   :  { %p2448_p7 = pnand %p2446_p6, %p2443_p5 }
 0xae0   :  { %2451 = shalt.err (!%p2448_p7)
}
 0xae1   :  { %1701 = dma.vmem_to_hbm [thread:$0]  %s1699_s14, 32, %s3140_s16, [#allocation3]  }
 0xae2   :  { %2452 = dma.done.wait [#allocation3], 32  }
 0xae3   :  { %2453 = vsyncadd [#allocation3], 4294967264 }
 0xae4   :  { %1705 = vsyncpa [#allocation3], 1 }

</bundles_post_ra>
